<compile_context>
chip_gen: v5e
topology: v5e:2x2
jax: 0.10.0
libtpu: 0.0.40
codegen_flags: <defaults>
</compile_context>

<pallas_src>
import math
import functools

import jax
import jax.numpy as jnp
from jax.experimental import pallas as pl
from jax.experimental.pallas import tpu as pltpu


# ----------------------------------------------------------------------------
# Parameter ("buffer") setup — plain JAX glue, deterministic, matches __init__.
# ----------------------------------------------------------------------------
def make_pe_buffer(d_model: int, max_len: int = 5000) -> jax.Array:
    """Returns the positional-encoding table as a dense [max_len, d_model]."""
    position = jnp.arange(max_len, dtype=jnp.float32)[:, None]            # [max_len, 1]
    div_term = jnp.exp(jnp.arange(0, d_model, 2, dtype=jnp.float32)
                       * (-math.log(10000.0) / d_model))                  # [d_model/2]
    pe = jnp.zeros((max_len, d_model), dtype=jnp.float32)
    pe = pe.at[:, 0::2].set(jnp.sin(position * div_term))
    pe = pe.at[:, 1::2].set(jnp.cos(position * div_term))
    return pe                                                             # [max_len, d_model]


# ----------------------------------------------------------------------------
# Tiling helper: pick a sequence tile so one x tile is ~2 MiB (pipelines well
# on v5e/v6e/v7x scoped-VMEM defaults), rounded to a multiple of 8 so the 2-D
# pe block satisfies the sublane constraint.
# ----------------------------------------------------------------------------
def _pick_tile_s(S: int, B: int, D: int, itemsize: int = 4,
                 target_bytes: int = 2 << 20) -> int:
    rows = max(1, target_bytes // max(1, B * D * itemsize))
    tile = min(S, rows)
    tile = max(8, ((tile + 7) // 8) * 8)   # multiple of 8 (sublane dim of pe block)
    return int(tile)


# ----------------------------------------------------------------------------
# Kernels
# ----------------------------------------------------------------------------
def pe_add_kernel(x_ref, pe_ref, o_ref):
    # x_ref: (TS, B, D), pe_ref: (TS, D) -> broadcast-add over the batch axis.
    o_ref[...] = x_ref[...] + pe_ref[...][:, None, :]


def pe_add_dropout_kernel(x_ref, pe_ref, bits_ref, o_ref, *, threshold: int,
                          scale: float):
    # Training-mode forward: (x + pe) then inverted dropout.
    # bits_ref holds int32 values uniform in [0, 2^31); keep iff bits >= T
    # where T = round(p * 2^31)  =>  P(keep) = 1 - p (exact integer compare).
    y = x_ref[...] + pe_ref[...][:, None, :]
    keep = bits_ref[...] >= jnp.int32(threshold)
    o_ref[...] = jnp.where(keep, y * jnp.float32(scale),
                           jnp.float32(0.0)).astype(o_ref.dtype)


# ----------------------------------------------------------------------------
# Wrapper
# ----------------------------------------------------------------------------
@functools.partial(jax.jit, static_argnames=("dropout_p", "training"))
def positional_encoding_forward(x, pe, key, *, dropout_p: float = 0.1,
                                training: bool = False):
    """x: [S, B, D] float32; pe: [max_len, D]; key: jax PRNG key (dropout)."""
    S, B, D = x.shape
    tile_s = _pick_tile_s(S, B, D, jnp.dtype(x.dtype).itemsize)
    grid = (pl.cdiv(S, tile_s),)

    x_spec = pl.BlockSpec((tile_s, B, D), lambda i: (i, 0, 0))
    pe_spec = pl.BlockSpec((tile_s, D), lambda i: (i, 0))      # rows of full buffer
    out_spec = pl.BlockSpec((tile_s, B, D), lambda i: (i, 0, 0))
    cparams = pltpu.CompilerParams(dimension_semantics=("parallel",))

    if (not training) or dropout_p == 0.0:
        # Eval mode: dropout is identity; hot path is the tiled broadcast add.
        return pl.pallas_call(
            pe_add_kernel,
            out_shape=jax.ShapeDtypeStruct((S, B, D), x.dtype),
            grid=grid,
            in_specs=[x_spec, pe_spec],
            out_specs=out_spec,
            compiler_params=cparams,
        )(x, pe)

    # Training mode: add + inverted dropout fused in the kernel.
    threshold = min(int(round(dropout_p * (1 << 31))), (1 << 31) - 1)
    scale = 1.0 / (1.0 - dropout_p)
    bits_u32 = jax.random.bits(key, (S, B, D), dtype=jnp.uint32)
    bits_i32 = jax.lax.shift_right_logical(bits_u32, jnp.uint32(1)).astype(jnp.int32)
    bits_spec = pl.BlockSpec((tile_s, B, D), lambda i: (i, 0, 0))

    return pl.pallas_call(
        functools.partial(pe_add_dropout_kernel, threshold=threshold, scale=scale),
        out_shape=jax.ShapeDtypeStruct((S, B, D), x.dtype),
        grid=grid,
        in_specs=[x_spec, pe_spec, bits_spec],
        out_specs=out_spec,
        compiler_params=cparams,
    )(x, pe, bits_i32)


# ----------------------------------------------------------------------------
# Demo / self-check
# ----------------------------------------------------------------------------
if __name__ == "__main__":
    seq_len, batch, d_model = 8, 2, 32
    max_len = 64  # small max_len for the demo buffer; same formula as max_len=5000

    key = jax.random.PRNGKey(0)
    kx, kdrop = jax.random.split(key)
    x = jax.random.normal(kx, (seq_len, batch, d_model), dtype=jnp.float32)
    pe = make_pe_buffer(d_model, max_len)

    # Eval-mode forward (dropout = identity) — checked against a pure-JAX ref.
    out_eval = positional_encoding_forward(x, pe, kdrop, dropout_p=0.1, training=False)
    out_eval = jax.block_until_ready(out_eval)
    ref = x + pe[:seq_len][:, None, :]
    assert out_eval.shape == (seq_len, batch, d_model)
    assert jnp.allclose(out_eval, ref, atol=1e-6, rtol=1e-6)

    # Training-mode forward (fused add + inverted dropout).
    # Note: the dropout mask will not bit-match torch's RNG stream — semantics
    # (keep prob 1-p, 1/(1-p) scaling on kept elements) are identical.
    p = 0.1
    out_train = positional_encoding_forward(x, pe, kdrop, dropout_p=p, training=True)
    out_train = jax.block_until_ready(out_train)
    assert out_train.shape == (seq_len, batch, d_model)
    scaled_ref = ref * (1.0 / (1.0 - p))
    either_dropped_or_scaled = jnp.where(
        out_train == 0.0, True,
        jnp.isclose(out_train, scaled_ref, atol=1e-5, rtol=1e-5))
    assert bool(jnp.all(either_dropped_or_scaled))

    print("KERNEL_OK")
</pallas_src>

<mosaic_0001>
module attributes {stable_mosaic.version = 11 : i64} {
  func.func @pe_add_kernel(%arg0: i32, %arg1: memref<8x2x32xf32, #tpu.memory_space<vmem>>, %arg2: memref<8x32xf32, #tpu.memory_space<vmem>>, %arg3: memref<8x2x32xf32, #tpu.memory_space<vmem>>) attributes {dimension_semantics = [#tpu.dimension_semantics<parallel>], iteration_bounds = array<i64: 1>, scalar_prefetch = 0 : i64, scratch_operands = 0 : i64, tpu.core_type = #tpu.core_type<tc>, window_params = [{transform_indices = @transform_0, window_bounds = array<i64: 8, 2, 32>}, {transform_indices = @transform_1, window_bounds = array<i64: 8, 32>}, {transform_indices = @transform_2, window_bounds = array<i64: 8, 2, 32>}]} {
    %c0 = arith.constant 0 : index
    %c0_0 = arith.constant 0 : index
    %c0_1 = arith.constant 0 : index
    %0 = vector.load %arg1[%c0, %c0_0, %c0_1] : memref<8x2x32xf32, #tpu.memory_space<vmem>>, vector<8x2x32xf32>
    %c0_2 = arith.constant 0 : index
    %c0_3 = arith.constant 0 : index
    %1 = vector.load %arg2[%c0_2, %c0_3] : memref<8x32xf32, #tpu.memory_space<vmem>>, vector<8x32xf32>
    %2 = vector.shape_cast %1 : vector<8x32xf32> to vector<8x1x32xf32>
    %3 = vector.broadcast %2 : vector<8x1x32xf32> to vector<8x2x32xf32>
    %4 = arith.addf %0, %3 : vector<8x2x32xf32>
    %c0_4 = arith.constant 0 : index
    %c0_5 = arith.constant 0 : index
    %c0_6 = arith.constant 0 : index
    %5 = vector.load %arg3[%c0_4, %c0_5, %c0_6] : memref<8x2x32xf32, #tpu.memory_space<vmem>>, vector<8x2x32xf32>
    tpu.vector_store %arg3[%c0_4, %c0_5, %c0_6], %4 {strides = array<i32>} : memref<8x2x32xf32, #tpu.memory_space<vmem>>, vector<8x2x32xf32>,
    return
  }
  func.func @transform_0(%arg0: i32) -> (i32, i32, i32) {
    %c0_i32 = arith.constant 0 : i32
    %c0_i32_0 = arith.constant 0 : i32
    %c0_i32_1 = arith.constant 0 : i32
    return %arg0, %c0_i32, %c0_i32_0 : i32, i32, i32
  }
  func.func @transform_1(%arg0: i32) -> (i32, i32) {
    %c0_i32 = arith.constant 0 : i32
    %c0_i32_0 = arith.constant 0 : i32
    return %arg0, %c0_i32 : i32, i32
  }
  func.func @transform_2(%arg0: i32) -> (i32, i32, i32) {
    %c0_i32 = arith.constant 0 : i32
    %c0_i32_0 = arith.constant 0 : i32
    %c0_i32_1 = arith.constant 0 : i32
    return %arg0, %c0_i32, %c0_i32_0 : i32, i32, i32
  }
}

</mosaic_0001>

<bundles_post_ra>
// kernel: positional_encoding_forward.1
= control target key start
LH: loop header
LB: loop body
LE: loop exit
PB: predicated region body
PF: predicated region fallthrough
CT: control target
= control target key end

     0   :  { %vm53_vm0 = vcmask 254976   ;;  %s165_s0 = inlined_call_operand.vmem [shape: f32[8,2,32], index: 0, kind: input, shape index: {}]   ;;  %s166_s1 = inlined_call_operand.vmem [shape: f32[64,32], index: 1, kind: input, shape index: {}]   ;;  %s167_s2 = inlined_call_operand.hbm [shape: f32[8,2,32], index: 2, kind: output, shape index: {}]  }
   0x1   :  { %v12_v0 = vld [vmem:[%s165_s0] sm:$0x3]  ;;  %v13_v2 = vld [vmem:[%s165_s0 + $0x2] sm:$0x3]  ;;  %v14_v5 = vld [vmem:[%s165_s0 + $0x4] sm:$0x3] }
   0x2   :  { %v20_v1 = vld [vmem:[%s166_s1] sm:$0xff]  ;;  %v16_v9 = vld [vmem:[%s165_s0 + $0x8] sm:$0x3]  ;;  %v17_v16 = vld [vmem:[%s165_s0 + $0xa] sm:$0x3] }
   0x3   :  { %v29_v3 = vperm.slane %v20_v1, 0  ;;  %v22_v4 = vrot.slane %v20_v1, 1  ;;  %v23_v6 = vrot.slane %v20_v1, 2  ;;  %v24_v7 = vrot.slane %v20_v1, 3  ;;  %v15_v8 = vld [vmem:[%s165_s0 + $0x6] sm:$0x3] }
   0x4   :  { %v25_v10 = vrot.slane %v20_v1, 4  ;;  %v26_v11 = vrot.slane %v20_v1, 5  ;;  %v27_v19 = vrot.slane %v20_v1, 6  ;;  %v28_v20 = vrot.slane %v20_v1, 7  ;;  %v18_v24 = vld [vmem:[%s165_s0 + $0xc] sm:$0x3] }
   0x5   :  { %v45_v12 = vadd.f32 %v29_v3, %v12_v0  ;;  %v30_v13 = vperm.slane %v22_v4, 0  ;;  %v31_v14 = vperm.slane %v23_v6, 0  ;;  %v32_v15 = vperm.slane %v24_v7, 0 }
   0x6   :  { %v33_v17 = vperm.slane %v25_v10, 0  ;;  %v34_v18 = vperm.slane %v26_v11, 0 }
   0x7   :  { %54 = vst.msk [vmem:[#allocation2] sm:$0x3] %vm53_vm0, %v45_v12  ;;  %v46_v21 = vadd.f32 %v30_v13, %v13_v2  ;;  %v47_v22 = vadd.f32 %v31_v14, %v14_v5  ;;  %v48_v23 = vadd.f32 %v32_v15, %v15_v8 }
   0x8   :  { %7 = vsyncpa [#allocation3], 0  ;;  %v49_v25 = vadd.f32 %v33_v17, %v16_v9  ;;  %v35_v26 = vperm.slane %v27_v19, 0  ;;  %v19_v27 = vld [vmem:[%s165_s0 + $0xe] sm:$0x3]  ;;  %v36_v28 = vperm.slane %v28_v20, 0  ;;  %v50_v29 = vadd.f32 %v34_v18, %v17_v16 }
   0x9   :  { %55 = vst.msk [vmem:[#allocation2 + $0x2] sm:$0x3] %vm53_vm0, %v46_v21  ;;  %s109_s26 = smov [#allocation2]   ;;  %s68_s30 = sshll.u32 %s167_s2, 4  ;;  %s69_s30 = int_to_ptr.hbm [resolvable:$true] %s68_s30 }
   0xa   :  { %s66_s27 = sshll.u32 %s109_s26, 4  ;;  %56 = vst.msk [vmem:[#allocation2 + $0x4] sm:$0x3] %vm53_vm0, %v47_v22  ;;  %v51_v30 = vadd.f32 %v35_v26, %v18_v24  ;;  %v52_v31 = vadd.f32 %v36_v28, %v19_v27  ;;  %s110_s0 = smov 32   ;;  %s67_s27 = int_to_ptr.vmem [resolvable:$true] %s66_s27 }
   0xb   :  { %57 = vst.msk [vmem:[#allocation2 + $0x6] sm:$0x3] %vm53_vm0, %v48_v23  ;;  %s111_s3 = smov 2  }
   0xc   :  { %58 = vst.msk [vmem:[#allocation2 + $0x8] sm:$0x3] %vm53_vm0, %v49_v25 }
   0xd   :  { %59 = vst.msk [vmem:[#allocation2 + $0xa] sm:$0x3] %vm53_vm0, %v50_v29 }
   0xe   :  { %60 = vst.msk [vmem:[#allocation2 + $0xc] sm:$0x3] %vm53_vm0, %v51_v30 }
   0xf   :  { %61 = vst.msk [vmem:[#allocation2 + $0xe] sm:$0x3] %vm53_vm0, %v52_v31 }
  0x10   :  { %74 = dma.vmem_to_hbm [thread:$0]  %s67_s27, 256, %s69_s30, [#allocation3], %s110_s0, %s110_s0, %s111_s3  }
  0x11   :  { %107 = dma.done.wait [#allocation3], 256  }
  0x12   :  { %108 = vsyncadd [#allocation3], 4294967040 }
  0x13   :  { %79 = vsyncpa [#allocation3], 1 }

</bundles_post_ra>
